<compile_context>
chip_gen: v7x
topology: tpu7x:2x2x1
jax: 0.10.0
libtpu: 0.0.40
codegen_flags: <defaults>
</compile_context>

<pallas_src>
import math
import functools

import jax
import jax.numpy as jnp
from jax.experimental import pallas as pl
from jax.experimental.pallas import tpu as pltpu


# --------------------------- chip-dependent defaults ---------------------------

def _tpu_defaults():
    kind = ""
    try:
        kind = jax.devices()[0].device_kind.lower()
    except Exception:
        pass
    if "v5 lite" in kind or "v5e" in kind or "v5litepod" in kind:
        # v5e: bm=256 is already near its HBM/MXU crossover; don't spend VMEM.
        return dict(bm=256, bn=256, bf=512, bq=256, bkv=512, vmem=64 << 20)
    if "v7" in kind:
        # v7x: only 64 MiB physical VMEM -> big row tiles, smaller d_ff tiles.
        return dict(bm=512, bn=256, bf=256, bq=512, bkv=512, vmem=48 << 20)
    # v6e (and default): 128 MiB VMEM, needs bm>=512 to reach MXU roofline.
    return dict(bm=512, bn=256, bf=512, bq=512, bkv=512, vmem=96 << 20)


_DEF = _tpu_defaults()


# ----------------------------- block-size / padding helpers -----------------------------

def _pick_block(dim, target, align):
    """Largest multiple of `align` <= target that divides dim, else full dim."""
    t = min(target, dim)
    t = (t // align) * align
    while t >= align:
        if dim % t == 0:
            return t
        t -= align
    return dim  # full extent (always a legal block)


def _pad_rows(x, mult=8):
    pad = (-x.shape[0]) % mult
    if pad:
        x = jnp.pad(x, ((0, pad), (0, 0)))
    return x


def _pad_cols(x, mult=128):
    pad = (-x.shape[1]) % mult
    if pad:
        x = jnp.pad(x, ((0, 0), (0, pad)))
    return x


# ----------------------------- Pallas kernels -----------------------------

def _ln_dense_kernel(x_ref, g_ref, b_ref, w_ref, bias_ref, o_ref, xn_sc, *, eps):
    # y = LayerNorm(x) @ W + bias.
    # LN stats + bf16 cast are computed once per row block (hoisted out of the
    # N-block loop) into xn_sc; the matmul runs per (row, col) block.
    @pl.when(pl.program_id(1) == 0)
    def _ln():
        x = x_ref[...].astype(jnp.float32)
        mu = jnp.mean(x, axis=-1, keepdims=True)
        var = jnp.mean(jnp.square(x - mu), axis=-1, keepdims=True)
        xn = (x - mu) * jax.lax.rsqrt(var + eps) * g_ref[...] + b_ref[...]
        xn_sc[...] = xn.astype(jnp.bfloat16)

    y = jnp.dot(xn_sc[...], w_ref[...],
                preferred_element_type=jnp.float32) + bias_ref[...]
    o_ref[...] = y.astype(o_ref.dtype)


def _dense_residual_kernel(x_ref, w_ref, b_ref, res_ref, o_ref):
    # y = res + x @ W + bias
    y = jnp.dot(x_ref[...].astype(jnp.bfloat16), w_ref[...],
                preferred_element_type=jnp.float32)
    o_ref[...] = (y + b_ref[...] + res_ref[...].astype(jnp.float32)
                  ).astype(o_ref.dtype)


def _ln_swiglu_kernel(x_ref, g_ref, b_ref, w1_ref, wv_ref, w2_ref, o_ref,
                      xn_sc, acc_sc, *, eps):
    # out = x + (SiLU(LN(x)@W1) * (LN(x)@Wv)) @ W2   accumulated over d_ff blocks
    f = pl.program_id(1)

    @pl.when(f == 0)
    def _init():
        x = x_ref[...].astype(jnp.float32)
        mu = jnp.mean(x, axis=-1, keepdims=True)
        var = jnp.mean(jnp.square(x - mu), axis=-1, keepdims=True)
        xn = (x - mu) * jax.lax.rsqrt(var + eps) * g_ref[...] + b_ref[...]
        xn_sc[...] = xn.astype(jnp.bfloat16)
        acc_sc[...] = jnp.zeros_like(acc_sc)

    xn = xn_sc[...]
    g = jnp.dot(xn, w1_ref[...], preferred_element_type=jnp.float32)
    g = g * jax.nn.sigmoid(g)                               # SiLU gate
    h = g * jnp.dot(xn, wv_ref[...], preferred_element_type=jnp.float32)
    acc_sc[...] += jnp.dot(h.astype(jnp.bfloat16), w2_ref[...],
                           preferred_element_type=jnp.float32)

    @pl.when(f == pl.num_programs(1) - 1)
    def _final():
        o_ref[...] = (acc_sc[...] + x_ref[...].astype(jnp.float32)
                      ).astype(o_ref.dtype)


def _flash_attn_kernel(q_ref, k_ref, v_ref, o_ref, q_sc, m_sc, l_sc, acc_sc,
                       *, scale, block_q, block_k):
    # one (batch*head, q-block) tile; online softmax over kv-blocks (grid axis 2)
    qi = pl.program_id(1)
    ki = pl.program_id(2)

    @pl.when(ki == 0)
    def _init():
        # scale + bf16 cast of q done once per q block, not once per kv step
        q_sc[...] = (q_ref[0].astype(jnp.float32) * scale).astype(jnp.bfloat16)
        m_sc[...] = jnp.full_like(m_sc, -1e30)
        l_sc[...] = jnp.zeros_like(l_sc)
        acc_sc[...] = jnp.zeros_like(acc_sc)

    q_lo = qi * block_q                    # first query row of this block
    q_hi = q_lo + block_q - 1              # last query row
    k_lo = ki * block_k                    # first key col of this block
    k_hi = k_lo + block_k - 1              # last key col

    def _step(masked):
        q = q_sc[...]
        k = k_ref[0].astype(jnp.bfloat16)
        v = v_ref[0].astype(jnp.bfloat16)
        # q @ k^T without an explicit transpose (contract last axes)
        s = jax.lax.dot_general(q, k, (((1,), (1,)), ((), ())),
                                preferred_element_type=jnp.float32)  # [bq, bk]
        if masked:
            rows = q_lo + jax.lax.broadcasted_iota(jnp.int32, s.shape, 0)
            cols = k_lo + jax.lax.broadcasted_iota(jnp.int32, s.shape, 1)
            s = jnp.where(cols <= rows, s, -1e30)          # finite mask (NaN-safe)
        m_prev = m_sc[...]                                 # (bq,128), lane-dense
        m_cur = jnp.max(s, axis=-1, keepdims=True)         # (bq,1)
        m_next = jnp.maximum(m_prev, m_cur)                # (bq,128)
        alpha = jnp.exp(m_prev - m_next)                   # (bq,128)
        p = jnp.exp(s - m_next[:, :1])                     # (bq,bk)
        l_sc[...] = alpha * l_sc[...] + jnp.sum(p, axis=-1, keepdims=True)
        acc_sc[...] = alpha[:, :1] * acc_sc[...] + jax.lax.dot_general(
            p.astype(jnp.bfloat16), v, (((1,), (0,)), ((), ())),
            preferred_element_type=jnp.float32)
        m_sc[...] = m_next

    # kv block strictly below the diagonal: no mask work at all
    @pl.when(k_hi <= q_lo)
    def _unmasked():
        _step(masked=False)

    # kv block straddling the diagonal: build the causal mask
    @pl.when(jnp.logical_and(k_hi > q_lo, k_lo <= q_hi))
    def _masked():
        _step(masked=True)

    # (blocks entirely in the future are skipped; their DMA is also elided
    #  because the k/v index maps clamp to the last visible block)

    @pl.when(ki == pl.num_programs(2) - 1)
    def _final():
        inv_l = pl.reciprocal(l_sc[...], approx=True)      # (bq,128), lanes equal
        o_ref[0] = (acc_sc[...] * inv_l[:, :1]).astype(o_ref.dtype)


# ----------------------------- Pallas wrappers -----------------------------

def ln_dense(x2d, gamma, beta, w, bias, *, out_dtype=jnp.float32, eps=1e-5,
             bm=None, bn=None):
    """out = LayerNorm(x) @ W + bias, tiled over (M, N) with full-K panels."""
    bm = _DEF["bm"] if bm is None else bm
    bn = _DEF["bn"] if bn is None else bn
    M0, K = x2d.shape
    N0 = w.shape[1]
    x2d = _pad_rows(x2d, 8)
    # Keep big output dims 128-aligned (e.g. vocab=50257) so the weight panel
    # can never fall back to a full-extent tile and blow VMEM.
    if N0 > 128 and N0 % 128:
        w = _pad_cols(w, 128)
        bias = _pad_cols(bias, 128)
    M, N = x2d.shape[0], w.shape[1]
    bm = _pick_block(M, bm, 8)
    bn = _pick_block(N, bn, 128)
    grid = (M // bm, N // bn)
    out = pl.pallas_call(
        functools.partial(_ln_dense_kernel, eps=eps),
        out_shape=jax.ShapeDtypeStruct((M, N), out_dtype),
        grid=grid,
        in_specs=[
            pl.BlockSpec((bm, K), lambda i, j: (i, 0)),
            pl.BlockSpec((1, K), lambda i, j: (0, 0)),
            pl.BlockSpec((1, K), lambda i, j: (0, 0)),
            pl.BlockSpec((K, bn), lambda i, j: (0, j)),
            pl.BlockSpec((1, bn), lambda i, j: (0, j)),
        ],
        out_specs=pl.BlockSpec((bm, bn), lambda i, j: (i, j)),
        scratch_shapes=[pltpu.VMEM((bm, K), jnp.bfloat16)],
        compiler_params=pltpu.CompilerParams(
            dimension_semantics=("parallel", "arbitrary"),
            vmem_limit_bytes=_DEF["vmem"]),
        cost_estimate=pl.CostEstimate(
            flops=2 * M * N * K, transcendentals=0,
            bytes_accessed=4 * M * K + 2 * K * N * (M // bm) + 4 * M * N),
    )(x2d, gamma, beta, w, bias)
    if (M, N) != (M0, N0):
        out = out[:M0, :N0]
    return out


def dense_residual(x2d, w, bias, res, *, bm=None, bn=None):
    """out = res + x @ W + bias, tiled over (M, N)."""
    bm = _DEF["bm"] if bm is None else bm
    bn = _DEF["bn"] if bn is None else bn
    M0, K = x2d.shape
    N0 = w.shape[1]
    x2d = _pad_rows(x2d, 8)
    res = _pad_rows(res, 8)
    if N0 > 128 and N0 % 128:
        w = _pad_cols(w, 128)
        bias = _pad_cols(bias, 128)
        res = _pad_cols(res, 128)
    M, N = x2d.shape[0], w.shape[1]
    bm = _pick_block(M, bm, 8)
    bn = _pick_block(N, bn, 128)
    grid = (M // bm, N // bn)
    out = pl.pallas_call(
        _dense_residual_kernel,
        out_shape=jax.ShapeDtypeStruct((M, N), jnp.float32),
        grid=grid,
        in_specs=[
            pl.BlockSpec((bm, K), lambda i, j: (i, 0)),
            pl.BlockSpec((K, bn), lambda i, j: (0, j)),
            pl.BlockSpec((1, bn), lambda i, j: (0, j)),
            pl.BlockSpec((bm, bn), lambda i, j: (i, j)),
        ],
        out_specs=pl.BlockSpec((bm, bn), lambda i, j: (i, j)),
        compiler_params=pltpu.CompilerParams(
            dimension_semantics=("parallel", "parallel"),
            vmem_limit_bytes=_DEF["vmem"]),
        cost_estimate=pl.CostEstimate(
            flops=2 * M * N * K, transcendentals=0,
            bytes_accessed=2 * M * K + 2 * K * N * (M // bm) + 8 * M * N),
    )(x2d, w, bias, res)
    if (M, N) != (M0, N0):
        out = out[:M0, :N0]
    return out


def ln_swiglu(x2d, gamma, beta, w1, wv, w2, *, eps=1e-5, bm=None, bf=None):
    """out = x + (SiLU(LN(x)@W1) * (LN(x)@Wv)) @ W2, accumulated over d_ff blocks."""
    bm = _DEF["bm"] if bm is None else bm
    bf = _DEF["bf"] if bf is None else bf
    M0, D = x2d.shape
    F0 = w1.shape[1]
    x2d = _pad_rows(x2d, 8)
    if F0 > 128 and F0 % 128:
        pad_f = (-F0) % 128
        w1 = _pad_cols(w1, 128)
        wv = _pad_cols(wv, 128)
        w2 = jnp.pad(w2, ((0, pad_f), (0, 0)))
    M, F = x2d.shape[0], w1.shape[1]
    bm = _pick_block(M, bm, 8)
    bf = _pick_block(F, bf, 128)
    grid = (M // bm, F // bf)
    out = pl.pallas_call(
        functools.partial(_ln_swiglu_kernel, eps=eps),
        out_shape=jax.ShapeDtypeStruct((M, D), jnp.float32),
        grid=grid,
        in_specs=[
            pl.BlockSpec((bm, D), lambda i, f: (i, 0)),
            pl.BlockSpec((1, D), lambda i, f: (0, 0)),
            pl.BlockSpec((1, D), lambda i, f: (0, 0)),
            pl.BlockSpec((D, bf), lambda i, f: (0, f)),
            pl.BlockSpec((D, bf), lambda i, f: (0, f)),
            pl.BlockSpec((bf, D), lambda i, f: (f, 0)),
        ],
        out_specs=pl.BlockSpec((bm, D), lambda i, f: (i, 0)),
        scratch_shapes=[pltpu.VMEM((bm, D), jnp.bfloat16),
                        pltpu.VMEM((bm, D), jnp.float32)],
        compiler_params=pltpu.CompilerParams(
            dimension_semantics=("parallel", "arbitrary"),
            vmem_limit_bytes=_DEF["vmem"]),
        cost_estimate=pl.CostEstimate(
            flops=6 * M * D * F, transcendentals=M * F,
            bytes_accessed=8 * M * D + 6 * D * F * (M // bm)),
    )(x2d, gamma, beta, w1, wv, w2)
    if M != M0:
        out = out[:M0]
    return out


def causal_attention(q, k, v, *, bq=None, bkv=None):
    """Flash-style causal attention; q,k,v : [batch*heads, seq, d_k] (bf16 ok)."""
    bq = _DEF["bq"] if bq is None else bq
    bkv = _DEF["bkv"] if bkv is None else bkv
    BH, S, DK = q.shape
    bq = _pick_block(S, bq, 8)
    bkv = _pick_block(S, bkv, 8)
    nq, nk = S // bq, S // bkv
    scale = 1.0 / math.sqrt(DK)
    grid = (BH, nq, nk)

    def kv_block(i, j):
        # Clamp to the last causally-visible kv block for this q block so the
        # DMA of fully-future blocks is elided (their compute is skipped too).
        last = (i * bq + bq - 1) // bkv
        return jnp.minimum(j, last)

    return pl.pallas_call(
        functools.partial(_flash_attn_kernel, scale=scale,
                          block_q=bq, block_k=bkv),
        out_shape=jax.ShapeDtypeStruct((BH, S, DK), jnp.bfloat16),
        grid=grid,
        in_specs=[
            pl.BlockSpec((1, bq, DK), lambda b, i, j: (b, i, 0)),
            pl.BlockSpec((1, bkv, DK), lambda b, i, j: (b, kv_block(i, j), 0)),
            pl.BlockSpec((1, bkv, DK), lambda b, i, j: (b, kv_block(i, j), 0)),
        ],
        out_specs=pl.BlockSpec((1, bq, DK), lambda b, i, j: (b, i, 0)),
        scratch_shapes=[pltpu.VMEM((bq, DK), jnp.bfloat16),   # scaled q
                        pltpu.VMEM((bq, 128), jnp.float32),   # running max (lane-dense)
                        pltpu.VMEM((bq, 128), jnp.float32),   # running denom (lane-dense)
                        pltpu.VMEM((bq, DK), jnp.float32)],   # output accumulator
        compiler_params=pltpu.CompilerParams(
            dimension_semantics=("parallel", "parallel", "arbitrary"),
            vmem_limit_bytes=_DEF["vmem"]),
        cost_estimate=pl.CostEstimate(
            flops=2 * BH * S * S * DK,
            transcendentals=BH * S * S // 2,
            bytes_accessed=2 * BH * S * DK * (2 + nq)),
    )(q, k, v)


# ----------------------------- model (JAX glue) -----------------------------

def _positional_encodings(seq_len, d_model):
    position = jnp.arange(seq_len, dtype=jnp.float32)[:, None]
    two_i = jnp.arange(0, d_model, 2, dtype=jnp.float32)
    div_term = jnp.exp(two_i * (-math.log(10000.0) / d_model))
    pe = jnp.zeros((seq_len, d_model), jnp.float32)
    pe = pe.at[:, 0::2].set(jnp.sin(position * div_term))
    pe = pe.at[:, 1::2].set(jnp.cos(position * div_term))
    return pe[:, None, :]                           # [S, 1, D]


def transformer_layer(x2d, p, *, S, B, n_heads):
    # x2d : [S*B, D] f32 residual stream (seq-major, matching labml layout)
    D = x2d.shape[1]
    d_k = D // n_heads

    # --- pre-norm self-attention sublayer (LN1 fused into QKV projection) ---
    qkv = ln_dense(x2d, p['ln1_g'], p['ln1_b'], p['wqkv'], p['bqkv'],
                   out_dtype=jnp.bfloat16)                    # [S*B, 3D]
    qkv = qkv.reshape(S, B, 3, n_heads, d_k)
    qkv = jnp.transpose(qkv, (2, 1, 3, 0, 4)).reshape(3, B * n_heads, S, d_k)
    # TODO(synk): fold the [S,B,H,Dk]<->[B*H,S,Dk] layout change into the
    # Pallas out_spec/in_spec instead of XLA transposes (one HBM round trip
    # per layer on each side).
    o = causal_attention(qkv[0], qkv[1], qkv[2])              # [B*H, S, Dk]
    o = jnp.transpose(o.reshape(B, n_heads, S, d_k),
                      (2, 0, 1, 3)).reshape(S * B, D)
    x2d = dense_residual(o, p['wo'], p['bo'], x2d)            # x + attn-proj

    # --- pre-norm gated-FFN sublayer (LN2 + SwiGLU + residual fused) ---
    x2d = ln_swiglu(x2d, p['ln2_g'], p['ln2_b'],
                    p['w1'], p['wv_ffn'], p['w2'])
    return x2d


def autoregressive_forward(params, src, *, d_model, n_heads):
    # src : [seq_len, batch] int tokens (labml seq-major convention)
    S, B = src.shape
    # src_embed: embedding gather kept in plain JAX glue
    pe = _positional_encodings(S, d_model)
    x = params['emb'][src] * math.sqrt(d_model) + pe          # [S, B, D] f32
    x2d = x.reshape(S * B, d_model)
    for p in params['layers']:
        x2d = transformer_layer(x2d, p, S=S, B=B, n_heads=n_heads)
    # encoder final LayerNorm fused into the generator projection
    logits = ln_dense(x2d, params['enc_norm_g'], params['enc_norm_b'],
                      params['gen_w'], params['gen_b'],
                      out_dtype=jnp.float32).reshape(S, B, -1)
    return logits, None                                       # matches module output


def init_params(key, *, n_vocab, d_model, d_ff, n_layers):
    keys = jax.random.split(key, 2 + n_layers)

    def rnd(k, shape, std=0.02, dtype=jnp.bfloat16):
        return (std * jax.random.normal(k, shape, jnp.float32)).astype(dtype)

    params = {
        'emb': rnd(keys[0], (n_vocab, d_model),
                   std=1.0 / math.sqrt(d_model), dtype=jnp.float32),
        'gen_w': rnd(keys[1], (d_model, n_vocab)),            # bf16 weight
        'gen_b': jnp.zeros((1, n_vocab), jnp.float32),
        'enc_norm_g': jnp.ones((1, d_model), jnp.float32),
        'enc_norm_b': jnp.zeros((1, d_model), jnp.float32),
        'layers': [],
    }
    for li in range(n_layers):
        lk = jax.random.split(keys[2 + li], 5)
        params['layers'].append({
            'ln1_g': jnp.ones((1, d_model), jnp.float32),
            'ln1_b': jnp.zeros((1, d_model), jnp.float32),
            'ln2_g': jnp.ones((1, d_model), jnp.float32),
            'ln2_b': jnp.zeros((1, d_model), jnp.float32),
            # fused Q|K|V projection weight / bias
            'wqkv': rnd(lk[0], (d_model, 3 * d_model)),
            'bqkv': jnp.zeros((1, 3 * d_model), jnp.float32),
            'wo': rnd(lk[1], (d_model, d_model)),
            'bo': jnp.zeros((1, d_model), jnp.float32),
            'w1': rnd(lk[2], (d_model, d_ff)),
            'wv_ffn': rnd(lk[3], (d_model, d_ff)),
            'w2': rnd(lk[4], (d_ff, d_model)),
        })
    return params


if __name__ == "__main__":
    SEQ, BATCH = 8, 2
    D_MODEL, HEADS, D_FF, VOCAB, LAYERS = 32, 4, 64, 64, 2

    key = jax.random.PRNGKey(0)
    pkey, dkey = jax.random.split(key)
    params = init_params(pkey, n_vocab=VOCAB, d_model=D_MODEL,
                         d_ff=D_FF, n_layers=LAYERS)
    src = jax.random.randint(dkey, (SEQ, BATCH), 0, VOCAB, dtype=jnp.int32)

    logits, extra = autoregressive_forward(params, src,
                                           d_model=D_MODEL, n_heads=HEADS)
    jax.block_until_ready(logits)

    assert logits.shape == (SEQ, BATCH, VOCAB)
    assert extra is None
    assert bool(jnp.all(jnp.isfinite(logits)))
    print("KERNEL_OK")
</pallas_src>

<mosaic_0001>
module attributes {stable_mosaic.version = 11 : i64} {
  func.func @_ln_dense_kernel(%arg0: i32, %arg1: i32, %arg2: memref<16x32xf32, #tpu.memory_space<vmem>>, %arg3: memref<1x32xf32, #tpu.memory_space<vmem>>, %arg4: memref<1x32xf32, #tpu.memory_space<vmem>>, %arg5: memref<32x96xbf16, #tpu.memory_space<vmem>>, %arg6: memref<1x96xf32, #tpu.memory_space<vmem>>, %arg7: memref<16x96xbf16, #tpu.memory_space<vmem>>, %arg8: memref<16x32xbf16, #tpu.memory_space<vmem>>) attributes {dimension_semantics = [#tpu.dimension_semantics<parallel>, #tpu.dimension_semantics<arbitrary>], iteration_bounds = array<i64: 1, 1>, scalar_prefetch = 0 : i64, scratch_operands = 1 : i64, tpu.core_type = #tpu.core_type<tc>, window_params = [{transform_indices = @transform_0, window_bounds = array<i64: 16, 32>}, {pipeline_mode = #tpu.pipeline_mode<synchronous>, transform_indices = @transform_1, window_bounds = array<i64: 1, 32>}, {pipeline_mode = #tpu.pipeline_mode<synchronous>, transform_indices = @transform_2, window_bounds = array<i64: 1, 32>}, {transform_indices = @transform_3, window_bounds = array<i64: 32, 96>}, {transform_indices = @transform_4, window_bounds = array<i64: 1, 96>}, {transform_indices = @transform_5, window_bounds = array<i64: 16, 96>}]} {
    %c0_i32 = arith.constant 0 : i32
    %0 = arith.cmpi eq, %arg1, %c0_i32 : i32
    %1 = arith.extui %0 : i1 to i32
    %c0_i32_0 = arith.constant 0 : i32
    %2 = arith.cmpi ne, %1, %c0_i32_0 : i32
    scf.if %2 {
      %c0_8 = arith.constant 0 : index
      %c0_9 = arith.constant 0 : index
      %11 = vector.load %arg2[%c0_8, %c0_9] : memref<16x32xf32, #tpu.memory_space<vmem>>, vector<16x32xf32>
      %cst_10 = arith.constant dense<0.000000e+00> : vector<16xf32>
      %12 = vector.multi_reduction <add>, %11, %cst_10 [1] : vector<16x32xf32> to vector<16xf32>
      %13 = vector.shape_cast %12 : vector<16xf32> to vector<16x1xf32>
      %cst_11 = arith.constant 3.200000e+01 : f32
      %14 = vector.broadcast %cst_11 : f32 to vector<16x1xf32>
      %15 = arith.divf %13, %14 : vector<16x1xf32>
      %16 = vector.broadcast %15 : vector<16x1xf32> to vector<16x32xf32>
      %17 = arith.subf %11, %16 : vector<16x32xf32>
      %18 = arith.mulf %17, %17 : vector<16x32xf32>
      %cst_12 = arith.constant dense<0.000000e+00> : vector<16xf32>
      %19 = vector.multi_reduction <add>, %18, %cst_12 [1] : vector<16x32xf32> to vector<16xf32>
      %20 = vector.shape_cast %19 : vector<16xf32> to vector<16x1xf32>
      %cst_13 = arith.constant 3.200000e+01 : f32
      %21 = vector.broadcast %cst_13 : f32 to vector<16x1xf32>
      %22 = arith.divf %20, %21 : vector<16x1xf32>
      %23 = vector.broadcast %15 : vector<16x1xf32> to vector<16x32xf32>
      %24 = arith.subf %11, %23 : vector<16x32xf32>
      %cst_14 = arith.constant 9.99999974E-6 : f32
      %25 = vector.broadcast %cst_14 : f32 to vector<16x1xf32>
      %26 = arith.addf %22, %25 : vector<16x1xf32>
      %27 = math.rsqrt %26 : vector<16x1xf32>
      %28 = vector.broadcast %27 : vector<16x1xf32> to vector<16x32xf32>
      %29 = arith.mulf %24, %28 : vector<16x32xf32>
      %c0_15 = arith.constant 0 : index
      %c0_16 = arith.constant 0 : index
      %30 = vector.load %arg3[%c0_15, %c0_16] : memref<1x32xf32, #tpu.memory_space<vmem>>, vector<1x32xf32>
      %31 = vector.broadcast %30 : vector<1x32xf32> to vector<16x32xf32>
      %32 = arith.mulf %29, %31 : vector<16x32xf32>
      %c0_17 = arith.constant 0 : index
      %c0_18 = arith.constant 0 : index
      %33 = vector.load %arg4[%c0_17, %c0_18] : memref<1x32xf32, #tpu.memory_space<vmem>>, vector<1x32xf32>
      %34 = vector.broadcast %33 : vector<1x32xf32> to vector<16x32xf32>
      %35 = arith.addf %32, %34 : vector<16x32xf32>
      %36 = arith.truncf %35 : vector<16x32xf32> to vector<16x32xbf16>
      %c0_19 = arith.constant 0 : index
      %c0_20 = arith.constant 0 : index
      %37 = vector.load %arg8[%c0_19, %c0_20] : memref<16x32xbf16, #tpu.memory_space<vmem>>, vector<16x32xbf16>
      tpu.vector_store %arg8[%c0_19, %c0_20], %36 {strides = array<i32>} : memref<16x32xbf16, #tpu.memory_space<vmem>>, vector<16x32xbf16>,
    } else {
    }
    %c0 = arith.constant 0 : index
    %c0_1 = arith.constant 0 : index
    %3 = vector.load %arg8[%c0, %c0_1] : memref<16x32xbf16, #tpu.memory_space<vmem>>, vector<16x32xbf16>
    %c0_2 = arith.constant 0 : index
    %c0_3 = arith.constant 0 : index
    %4 = vector.load %arg5[%c0_2, %c0_3] : memref<32x96xbf16, #tpu.memory_space<vmem>>, vector<32x96xbf16>
    %cst = arith.constant dense<0.000000e+00> : vector<16x96xf32>
    %5 = tpu.matmul %3, %4, %cst {dimension_numbers = #tpu.dot_dimension_numbers<[1], [0], [0], [1], [0, 0, 1, 1], [], []>} : vector<16x32xbf16>, vector<32x96xbf16>, vector<16x96xf32> -> vector<16x96xf32>
    %c0_4 = arith.constant 0 : index
    %c0_5 = arith.constant 0 : index
    %6 = vector.load %arg6[%c0_4, %c0_5] : memref<1x96xf32, #tpu.memory_space<vmem>>, vector<1x96xf32>
    %7 = vector.broadcast %6 : vector<1x96xf32> to vector<16x96xf32>
    %8 = arith.addf %5, %7 : vector<16x96xf32>
    %9 = arith.truncf %8 : vector<16x96xf32> to vector<16x96xbf16>
    %c0_6 = arith.constant 0 : index
    %c0_7 = arith.constant 0 : index
    %10 = vector.load %arg7[%c0_6, %c0_7] : memref<16x96xbf16, #tpu.memory_space<vmem>>, vector<16x96xbf16>
    tpu.vector_store %arg7[%c0_6, %c0_7], %9 {strides = array<i32>} : memref<16x96xbf16, #tpu.memory_space<vmem>>, vector<16x96xbf16>,
    return
  }
  func.func @transform_0(%arg0: i32, %arg1: i32) -> (i32, i32) {
    %c0_i32 = arith.constant 0 : i32
    %c0_i32_0 = arith.constant 0 : i32
    return %arg0, %c0_i32 : i32, i32
  }
  func.func @transform_1(%arg0: i32, %arg1: i32) -> (i32, i32) {
    %c0_i32 = arith.constant 0 : i32
    %c0_i32_0 = arith.constant 0 : i32
    %c0_i32_1 = arith.constant 0 : i32
    return %c0_i32, %c0_i32_0 : i32, i32
  }
  func.func @transform_2(%arg0: i32, %arg1: i32) -> (i32, i32) {
    %c0_i32 = arith.constant 0 : i32
    %c0_i32_0 = arith.constant 0 : i32
    %c0_i32_1 = arith.constant 0 : i32
    return %c0_i32, %c0_i32_0 : i32, i32
  }
  func.func @transform_3(%arg0: i32, %arg1: i32) -> (i32, i32) {
    %c0_i32 = arith.constant 0 : i32
    %c0_i32_0 = arith.constant 0 : i32
    return %c0_i32, %arg1 : i32, i32
  }
  func.func @transform_4(%arg0: i32, %arg1: i32) -> (i32, i32) {
    %c0_i32 = arith.constant 0 : i32
    %c0_i32_0 = arith.constant 0 : i32
    return %c0_i32, %arg1 : i32, i32
  }
  func.func @transform_5(%arg0: i32, %arg1: i32) -> (i32, i32) {
    %c0_i32 = arith.constant 0 : i32
    return %arg0, %arg1 : i32, i32
  }
}

</mosaic_0001>

<bundles_post_ra>
// kernel: tpu_custom_call.1
= control target key start
LH: loop header
LB: loop body
LE: loop exit
PB: predicated region body
PF: predicated region fallthrough
CT: control target
= control target key end

     0   :  { %10 = vsyncpa [#allocation4], 0  ;;  %s549_s0 = inlined_call_operand.hbm [shape: f32[16,32], index: 0, kind: input, shape index: {}]   ;;  %s550_s1 = inlined_call_operand.hbm [shape: f32[1,32], index: 1, kind: input, shape index: {}]   ;;  %s551_s2 = inlined_call_operand.hbm [shape: f32[1,32], index: 2, kind: input, shape index: {}]   ;;  %s552_s3 = inlined_call_operand.hbm [shape: bf16[32,96], index: 3, kind: input, shape index: {}]   ;;  %s553_s4 = inlined_call_operand.hbm [shape: f32[1,96], index: 4, kind: input, shape index: {}]   ;;  %s554_s5 = inlined_call_operand.hbm [shape: bf16[16,96], index: 5, kind: output, shape index: {}]  }
   0x1   :  { %11 = vsyncpa [#allocation7], 0 }
   0x2   :  { %12 = vsyncpa [#allocation10], 0 }
   0x3   :  { %13 = vsyncpa [#allocation5], 0  ;;  %s416_s18 = smov [#allocation6]   ;;  %s417_s20 = smov [#allocation9]  }
   0x4   :  { %s32_s19 = sshll.u32 %s416_s18, 4  ;;  %s51_s21 = sshll.u32 %s417_s20, 4  ;;  %s33_s19 = int_to_ptr.vmem [resolvable:$true] %s32_s19  ;;  %s458_s21 = int_to_ptr.vmem [resolvable:$true] %s51_s21 }
   0x5   :  { %s276_s24 = scalar_lea.hbm %s550_s1, 16 }
   0x6   :  { %p277_p0 = scmp.ne.s32.totalorder %s550_s1, %s276_s24  ;;  %p280_p1 = scmp.lt.u32.totalorder %s276_s24, %s550_s1 }
   0x8   :  { %p282_p2 = pnand %p280_p1, %p277_p0 }
   0xa   :  { %285 = shalt.err (!%p282_p2)
}
   0xb   :  { %s286_s29 = scalar_lea.vmem %s33_s19, 16  ;;  %s290_s30 = scalar_lea.vmem %s33_s19, 32 }
   0xc   :  { %p287_p3 = scmp.ne.s32.totalorder %s33_s19, %s286_s29  ;;  %p291_p4 = scmp.lt.s32.totalorder %s33_s19, %s33_s19 }
   0xd   :  { %p292_p5 = scmp.lt.s32.totalorder %s290_s30, %s286_s29 }
   0xf   :  { %p293_p6 = por %p292_p5, %p291_p4 }
  0x11   :  { %p294_p7 = pnand %p293_p6, %p287_p3 }
  0x13   :  { %297 = shalt.err (!%p294_p7)
}
  0x14   :  { %35 = dma.hbm_to_vmem [thread:$0]  %s550_s1, 16, %s33_s19, [#allocation7]  }
  0x15   :  { %s298_s10 = scalar_lea.hbm %s552_s3, 256 }
  0x16   :  { %p299_p8 = scmp.ne.s32.totalorder %s552_s3, %s298_s10  ;;  %p302_p9 = scmp.lt.u32.totalorder %s298_s10, %s552_s3 }
  0x18   :  { %p304_p10 = pnand %p302_p9, %p299_p8 }
  0x1a   :  { %307 = shalt.err (!%p304_p10)
}
  0x1b   :  { %s308_s15 = scalar_lea.vmem %s458_s21, 256  ;;  %p313_p12 = scmp.lt.s32.totalorder %s458_s21, %s458_s21 }
  0x1c   :  { %p309_p11 = scmp.ne.s32.totalorder %s458_s21, %s308_s15  ;;  %p314_p13 = scmp.lt.s32.totalorder %s308_s15, %s308_s15 }
  0x1e   :  { %p315_p0 = por %p314_p13, %p313_p12 }
  0x20   :  { %p316_p1 = pnand %p315_p0, %p309_p11 }
  0x22   :  { %319 = shalt.err (!%p316_p1)
}
  0x23   :  { %s418_s1 = smov 64   ;;  %s419_s16 = smov 4  }
  0x24   :  { %57 = dma.hbm_to_vmem [thread:$0]  %s552_s3, 256, %s458_s21, [#allocation10], %s418_s1, %s418_s1, %s419_s16  }
  0x25   :  { %s420_s19 = smov [#allocation3]   ;;  %s320_s24 = scalar_lea.hbm %s549_s0, 256 }
  0x26   :  { %s19_s20 = sshll.u32 %s420_s19, 4  ;;  %p321_p2 = scmp.ne.s32.totalorder %s549_s0, %s320_s24  ;;  %s20_s20 = int_to_ptr.vmem [resolvable:$true] %s19_s20 }
  0x27   :  { %p324_p3 = scmp.lt.u32.totalorder %s320_s24, %s549_s0 }
  0x29   :  { %p326_p4 = pnand %p324_p3, %p321_p2 }
  0x2b   :  { %329 = shalt.err (!%p326_p4)
}
  0x2c   :  { %s330_s29 = scalar_lea.vmem %s20_s20, 256  ;;  %p335_p6 = scmp.lt.s32.totalorder %s20_s20, %s20_s20 }
  0x2d   :  { %p331_p5 = scmp.ne.s32.totalorder %s20_s20, %s330_s29  ;;  %p336_p7 = scmp.lt.s32.totalorder %s330_s29, %s330_s29 }
  0x2f   :  { %p337_p8 = por %p336_p7, %p335_p6 }
  0x31   :  { %p338_p9 = pnand %p337_p8, %p331_p5 }
  0x33   :  { %341 = shalt.err (!%p338_p9)
}
  0x34   :  { %s421_s3 = smov 128   ;;  %s422_s21 = smov 8  }
  0x35   :  { %25 = dma.hbm_to_vmem [thread:$0]  %s549_s0, 256, %s20_s20, [#allocation4], %s421_s3, %s421_s3, %s422_s21  }
  0x36   :  { %s423_s7 = smov [#allocation8]   ;;  %s424_s9 = smov [#allocation11]  }
  0x37   :  { %s42_s8 = sshll.u32 %s423_s7, 4  ;;  %s64_s10 = sshll.u32 %s424_s9, 4  ;;  %s43_s8 = int_to_ptr.vmem [resolvable:$true] %s42_s8  ;;  %s65_s10 = int_to_ptr.vmem [resolvable:$true] %s64_s10 }
  0x38   :  { %s342_s13 = scalar_lea.hbm %s551_s2, 16 }
  0x39   :  { %p343_p10 = scmp.ne.s32.totalorder %s551_s2, %s342_s13  ;;  %p346_p11 = scmp.lt.u32.totalorder %s342_s13, %s551_s2 }
  0x3b   :  { %p348_p12 = pnand %p346_p11, %p343_p10 }
  0x3d   :  { %351 = shalt.err (!%p348_p12)
}
  0x3e   :  { %s352_s0 = scalar_lea.vmem %s43_s8, 16  ;;  %s356_s19 = scalar_lea.vmem %s43_s8, 32 }
  0x3f   :  { %p353_p13 = scmp.ne.s32.totalorder %s43_s8, %s352_s0  ;;  %p357_p0 = scmp.lt.s32.totalorder %s43_s8, %s43_s8 }
  0x40   :  { %p358_p1 = scmp.lt.s32.totalorder %s356_s19, %s352_s0 }
  0x42   :  { %p359_p2 = por %p358_p1, %p357_p0 }
  0x44   :  { %p360_p3 = pnand %p359_p2, %p353_p13 }
  0x46   :  { %363 = shalt.err (!%p360_p3)
}
  0x47   :  { %45 = dma.hbm_to_vmem [thread:$0]  %s551_s2, 16, %s43_s8, [#allocation7]  }
  0x48   :  { %s364_s25 = scalar_lea.hbm %s553_s4, 16 }
  0x49   :  { %p365_p4 = scmp.ne.s32.totalorder %s553_s4, %s364_s25  ;;  %p368_p5 = scmp.lt.u32.totalorder %s364_s25, %s553_s4 }
  0x4b   :  { %p370_p6 = pnand %p368_p5, %p365_p4 }
  0x4d   :  { %373 = shalt.err (!%p370_p6)
}
  0x4e   :  { %s374_s3 = scalar_lea.vmem %s65_s10, 16  ;;  %s378_s21 = scalar_lea.vmem %s65_s10, 32 }
  0x4f   :  { %p375_p7 = scmp.ne.s32.totalorder %s65_s10, %s374_s3  ;;  %p379_p8 = scmp.lt.s32.totalorder %s65_s10, %s65_s10 }
  0x50   :  { %p380_p9 = scmp.lt.s32.totalorder %s378_s21, %s374_s3 }
  0x52   :  { %p381_p10 = por %p380_p9, %p379_p8 }
  0x54   :  { %p382_p11 = pnand %p381_p10, %p375_p7 }
  0x56   :  { %385 = shalt.err (!%p382_p11)
}
  0x57   :  { %67 = dma.hbm_to_vmem [thread:$0]  %s553_s4, 16, %s65_s10, [#allocation10]  }
  0x58   :  { %408 = dma.done.wait [#allocation4], 256  }
  0x59   :  { %409 = vsyncadd [#allocation4], 4294967040 }
  0x5a   :  { %410 = dma.done.wait [#allocation7], 32  }
  0x5b   :  { %411 = vsyncadd [#allocation7], 4294967264 }
  0x5c   :  { %412 = dma.done.wait [#allocation10], 272  }
  0x5d   :  { %413 = vsyncadd [#allocation10], 4294967024  ;;  %vm90_vm0 = vcmask 261120   ;;  %v88_v0 = vld [vmem:[#allocation3] sm:$0xff]  ;;  %v89_v1 = vld [vmem:[#allocation3 + $0x8] sm:$0xff]  ;;  %v425_v15 = vmov 0.0  }
  0x5e   :  { %v91_v2 = vsel %vm90_vm0, %v88_v0, 0.0  ;;  %v94_v3 = vsel %vm90_vm0, %v89_v1, 0.0  ;;  %v270_v14 = vld [vmem:[#allocation9] sm:$0xff]   ;;  %250 = vmatprep.subr.bf16.mxu0 %v425_v15  ;;  %v271_v16 = vld [vmem:[#allocation9 + $0x8] sm:$0xff]   ;;  %vm426_vm1 = vmmov 0   ;;  %vm215_vm2 = vcmask 781312  }
  0x5f   :  { %92 = vadd.xlane.f32.xlu0 %v91_v2  ;;  %251 = vmatpush3.bf16.msra.mxu0 %v270_v14  ;;  %v237_v25 = vld [vmem:[#allocation6] ss:$0 sm:$0xff]  ;;  %v238_v29 = vld [vmem:[#allocation8] ss:$0 sm:$0xff]  ;;  %v239_v35 = vld [vmem:[#allocation11] ss:$0 sm:$0xff] }
  0x60   :  { %254 = vmatprep.mubr.msk.bf16.mxu0 %vm426_vm1, %v425_v15  ;;  %252 = vmatprep.subr.bf16.mxu0 %v425_v15  ;;  %s427_s4 = smov [#allocation12]  }
  0x61   :  { %s223_s6 = sshll.u32 %s427_s4, 4  ;;  %s224_s6 = int_to_ptr.vmem [resolvable:$true] %s223_s6 }
  0x62   :  { %s386_s7 = scalar_lea.vmem %s224_s6, 128  ;;  %p391_p13 = scmp.lt.s32.totalorder %s224_s6, %s224_s6 }
  0x63   :  { %95 = vadd.xlane.f32.xlu0 %v94_v3  ;;  %253 = vmatpush3.bf16.msra.mxu0 %v271_v16  ;;  %p387_p12 = scmp.ne.s32.totalorder %s224_s6, %s386_s7  ;;  %p392_p0 = scmp.lt.s32.totalorder %s386_s7, %s386_s7 }
  0x65   :  { %p393_p1 = por %p392_p0, %p391_p13 }
  0x67   :  { %p394_p2 = pnand %p393_p1, %p387_p12 }
  0xec   :  { %v93_v4 = vpop.xlane.xlu0 %92 }
  0xed   :  { %v98_v5 = vmul.f32 0.03125, %v93_v4 }
  0xef   :  { %v100_v6 = vsub.f32 %v88_v0, %v98_v5 }
  0xf0   :  { %v96_v7 = vpop.xlane.xlu0 %95 }
  0xf1   :  { %v99_v8 = vmul.f32 0.03125, %v96_v7  ;;  %v102_v9 = vmul.f32 %v100_v6, %v100_v6 }
  0xf3   :  { %v101_v10 = vsub.f32 %v89_v1, %v99_v8  ;;  %v104_v11 = vsel %vm90_vm0, %v102_v9, 0.0 }
  0xf4   :  { %105 = vadd.xlane.f32.xlu1 %v104_v11 }
  0xf5   :  { %v103_v12 = vmul.f32 %v101_v10, %v101_v10 }
  0xf7   :  { %v107_v13 = vsel %vm90_vm0, %v103_v12, 0.0 }
  0xf8   :  { %108 = vadd.xlane.f32.xlu1 %v107_v13 }
 0x181   :  { %v106_v17 = vpop.xlane.xlu1 %105 }
 0x182   :  { %v110_v18 = vmul.f32 0.03125, %v106_v17 }
 0x184   :  { %v112_v19 = vadd.f32 1e-05, %v110_v18 }
 0x185   :  { %v109_v20 = vpop.xlane.xlu1 %108 }
 0x186   :  { %272 = vrsqrt.f32 %v112_v19  ;;  %v111_v21 = vmul.f32 0.03125, %v109_v20 }
 0x188   :  { %v113_v22 = vadd.f32 1e-05, %v111_v21 }
 0x18a   :  { %274 = vrsqrt.f32 %v113_v22 }
 0x190   :  { %v273_v23 = vpop.eup %272 }
 0x191   :  { %v116_v24 = vmul.f32 %v273_v23, %v100_v6 }
 0x193   :  { %v125_v27 = vmul.f32 %v237_v25, %v116_v24 }
 0x194   :  { %v275_v26 = vpop.eup %274 }
 0x195   :  { %v117_v28 = vmul.f32 %v275_v26, %v101_v10  ;;  %v134_v31 = vadd.f32 %v238_v29, %v125_v27 }
 0x197   :  { %v126_v30 = vmul.f32 %v237_v25, %v117_v28 }
 0x199   :  { %v135_v32 = vadd.f32 %v238_v29, %v126_v30 }
 0x19b   :  { %v136_v33 = vpack.c.bf16 %v135_v32, %v134_v31 }
 0x19d   :  { %137 = vst.msk [vmem:[#allocation2] sm:$0xff] %vm90_vm0, %v136_v33 }
 0x1a4   :  { %v138_v34 = vld [vmem:[#allocation2] sm:$0xff] }
 0x1a5   :  { %255 = vmatmul.mubr.msk.bf16.vlgmr.msra.gmra.mrb[0].mxu0 %vm90_vm0, %v138_v34 }
 0x278   :  { %v200_v36 = vpop.f32.mrb[0].mxu0 }
 0x279   :  { %v201_v37 = vadd.f32 %v239_v35, %v200_v36  ;;  %v256_v38 = vpop.f32.mrb[1].mxu0 }
 0x27a   :  { %v203_v39 = vpop.f32.mrb[2].mxu0 }
 0x27b   :  { %v245_v40 = vpack.c.bf16 %v201_v37, %v201_v37  ;;  %v204_v41 = vadd.f32 %v239_v35, %v203_v39  ;;  %v257_v42 = vpop.f32.mrb[3].mxu0 }
 0x27d   :  { %v246_v43 = vpack.c.bf16 %v204_v41, %v204_v41  ;;  %216 = vst.msk [vmem:[#allocation12] sm:$0xf] %vm215_vm2, %v245_v40 }
 0x27f   :  { %217 = vst.msk [vmem:[#allocation12 + $0x4] sm:$0xf] %vm215_vm2, %v246_v43 }
 0x280   :  { %397 = shalt.err (!%p394_p2)
}
 0x281   :  { %s398_s10 = scalar_lea.hbm %s554_s5, 128 }
 0x282   :  { %p399_p3 = scmp.ne.s32.totalorder %s554_s5, %s398_s10  ;;  %p402_p4 = scmp.lt.u32.totalorder %s398_s10, %s554_s5 }
 0x284   :  { %p404_p5 = pnand %p402_p4, %p399_p3 }
 0x286   :  { %407 = shalt.err (!%p404_p5)
}
 0x287   :  { %229 = dma.vmem_to_hbm [thread:$0]  %s224_s6, 128, %s554_s5, [#allocation5], %s418_s1, %s418_s1, %s419_s16  }
 0x288   :  { %414 = dma.done.wait [#allocation5], 128  }
 0x289   :  { %415 = vsyncadd [#allocation5], 4294967168 }
 0x28a   :  { %233 = vsyncpa [#allocation4], 1 }
 0x28b   :  { %234 = vsyncpa [#allocation7], 1 }
 0x28c   :  { %235 = vsyncpa [#allocation10], 1 }
 0x28d   :  { %236 = vsyncpa [#allocation5], 1 }

</bundles_post_ra>
